<compile_context>
chip_gen: v6e
topology: v6e:2x2x1
jax: 0.10.0
libtpu: 0.0.40
codegen_flags: <defaults>
</compile_context>

<pallas_src>
import functools

import jax
import jax.numpy as jnp
from jax.experimental import pallas as pl
from jax.experimental.pallas import tpu as pltpu

_LANE = 128      # vreg lane width (last dim)
_SUBLANE = 8     # f32 sublane count (second-to-last dim)


def _round_up(n, m):
    return ((n + m - 1) // m) * m


def _fused_mlp_kernel(x_ref, *refs, layer_cnt):
    # refs = (w0, b0, w1, b1, ..., w_{L-1}, b_{L-1}, o_ref)
    o_ref = refs[-1]
    params = refs[:-1]
    h = x_ref[...]
    for i in range(layer_cnt):
        w_ref = params[2 * i]       # (Din_pad, Dout_pad)  -- pre-transposed W.T
        b_ref = params[2 * i + 1]   # (1, Dout_pad)
        h = jnp.dot(h, w_ref[...], preferred_element_type=jnp.float32)
        h = h + b_ref[...]
        if i < layer_cnt - 1:
            h = jnp.maximum(h, 0.0)
    o_ref[...] = h.astype(o_ref.dtype)


def _forward(x, *flat_params, layer_cnt, dims, dims_padded, batch_tile):
    batch, din = x.shape
    d0_p = dims_padded[0]
    d_last = dims[-1]
    d_last_p = dims_padded[-1]

    # Batch tile: multiple of 8 sublanes; cap at batch_tile and pad the batch
    # so the grid divides evenly.
    if batch >= batch_tile:
        tb = batch_tile
    else:
        tb = _round_up(batch, _SUBLANE)
    batch_p = _round_up(batch, tb)
    n_tiles = batch_p // tb

    # Zero-pad activations to (batch_p, d0_p); padded lanes/rows stay inert
    # (zero weights / bias in padded lanes) and are sliced off at the end.
    x_p = jnp.zeros((batch_p, d0_p), x.dtype).at[:batch, :din].set(x)

    in_specs = [pl.BlockSpec((tb, d0_p), lambda i: (i, 0))]
    for p in flat_params:
        # Weights / biases are grid-resident (constant block index across the
        # batch grid) -> single DMA, held in VMEM for all tiles.
        in_specs.append(pl.BlockSpec(p.shape, lambda i: (0, 0)))

    kernel = functools.partial(_fused_mlp_kernel, layer_cnt=layer_cnt)
    out_p = pl.pallas_call(
        kernel,
        out_shape=jax.ShapeDtypeStruct((batch_p, d_last_p), x.dtype),
        grid=(n_tiles,),
        in_specs=in_specs,
        out_specs=pl.BlockSpec((tb, d_last_p), lambda i: (i, 0)),
        compiler_params=pltpu.CompilerParams(
            dimension_semantics=("parallel",)),
    )(x_p, *flat_params)

    return out_p[:batch, :d_last]


class NLayerNNPallas:
    """Pallas port of NLayerNN: MLP with ReLU between layers (not after last)."""

    def __init__(self, dims, key, *, batch_tile=128):
        # dims = (d0, d1, ..., dL) -> L Linear layers (d_i -> d_{i+1}).
        self.layer_cnt = len(dims) - 1
        self.dims = tuple(int(d) for d in dims)
        self.dims_padded = tuple(_round_up(d, _LANE) for d in self.dims)
        self.batch_tile = int(batch_tile)

        self.params = []          # raw (unpadded) (W^T, b) for the reference
        flat_params_padded = []   # lane-padded (W^T, b) fed to the kernel
        for i in range(self.layer_cnt):
            din, dout = self.dims[i], self.dims[i + 1]
            din_p, dout_p = self.dims_padded[i], self.dims_padded[i + 1]
            key, kw, kb = jax.random.split(key, 3)
            # Same scale convention as nn.Linear default (uniform +-1/sqrt(fan_in)).
            bound = 1.0 / float(din) ** 0.5
            w = jax.random.uniform(kw, (dout, din), jnp.float32, -bound, bound)
            b = jax.random.uniform(kb, (dout,), jnp.float32, -bound, bound)
            w_t = w.T                                   # (din, dout)
            self.params.append((w_t, b.reshape(1, dout)))
            w_t_p = jnp.zeros((din_p, dout_p), jnp.float32).at[:din, :dout].set(w_t)
            b_p = jnp.zeros((1, dout_p), jnp.float32).at[:, :dout].set(b)
            flat_params_padded.append(w_t_p)
            flat_params_padded.append(b_p)
        self.flat_params_padded = tuple(flat_params_padded)

        # jit the whole forward so pad/slice fuse with the custom call.
        self._jit_forward = jax.jit(functools.partial(
            _forward,
            layer_cnt=self.layer_cnt,
            dims=self.dims,
            dims_padded=self.dims_padded,
            batch_tile=self.batch_tile,
        ))

    def __call__(self, x):
        assert x.ndim == 2 and x.shape[1] == self.dims[0]
        return self._jit_forward(x, *self.flat_params_padded)


def reference_forward(model, x):
    # Pure-JAX reference (unpadded params) for correctness checking.
    for i, (w_t, b) in enumerate(model.params):
        x = x @ w_t + b
        if i < model.layer_cnt - 1:
            x = jnp.maximum(x, 0.0)
    return x


if __name__ == "__main__":
    key = jax.random.PRNGKey(0)
    k_model, k_x = jax.random.split(key)

    dims = (32, 64, 48, 16)  # 3 Linear layers: 32 -> 64 -> 48 -> 16
    batch = 8

    model = NLayerNNPallas(dims, k_model)
    x = jax.random.normal(k_x, (batch, dims[0]), jnp.float32)

    out = model(x)
    out = jax.block_until_ready(out)

    ref = reference_forward(model, x)
    assert out.shape == (batch, dims[-1])
    assert jnp.allclose(out, ref, atol=1e-5, rtol=1e-5)

    print("KERNEL_OK")
</pallas_src>

<mosaic_0001>
module attributes {stable_mosaic.version = 11 : i64} {
  func.func @_fused_mlp_kernel(%arg0: i32, %arg1: memref<8x128xf32, #tpu.memory_space<vmem>>, %arg2: memref<128x128xf32, #tpu.memory_space<vmem>>, %arg3: memref<1x128xf32, #tpu.memory_space<vmem>>, %arg4: memref<128x128xf32, #tpu.memory_space<vmem>>, %arg5: memref<1x128xf32, #tpu.memory_space<vmem>>, %arg6: memref<128x128xf32, #tpu.memory_space<vmem>>, %arg7: memref<1x128xf32, #tpu.memory_space<vmem>>, %arg8: memref<8x128xf32, #tpu.memory_space<vmem>>) attributes {dimension_semantics = [#tpu.dimension_semantics<parallel>], iteration_bounds = array<i64: 1>, scalar_prefetch = 0 : i64, scratch_operands = 0 : i64, tpu.core_type = #tpu.core_type<tc>, window_params = [{transform_indices = @transform_0, window_bounds = array<i64: 8, 128>}, {pipeline_mode = #tpu.pipeline_mode<synchronous>, transform_indices = @transform_1, window_bounds = array<i64: 128, 128>}, {pipeline_mode = #tpu.pipeline_mode<synchronous>, transform_indices = @transform_2, window_bounds = array<i64: 1, 128>}, {pipeline_mode = #tpu.pipeline_mode<synchronous>, transform_indices = @transform_3, window_bounds = array<i64: 128, 128>}, {pipeline_mode = #tpu.pipeline_mode<synchronous>, transform_indices = @transform_4, window_bounds = array<i64: 1, 128>}, {pipeline_mode = #tpu.pipeline_mode<synchronous>, transform_indices = @transform_5, window_bounds = array<i64: 128, 128>}, {pipeline_mode = #tpu.pipeline_mode<synchronous>, transform_indices = @transform_6, window_bounds = array<i64: 1, 128>}, {transform_indices = @transform_7, window_bounds = array<i64: 8, 128>}]} {
    %c0 = arith.constant 0 : index
    %c0_0 = arith.constant 0 : index
    %0 = vector.load %arg1[%c0, %c0_0] : memref<8x128xf32, #tpu.memory_space<vmem>>, vector<8x128xf32>
    %c0_1 = arith.constant 0 : index
    %c0_2 = arith.constant 0 : index
    %1 = vector.load %arg2[%c0_1, %c0_2] : memref<128x128xf32, #tpu.memory_space<vmem>>, vector<128x128xf32>
    %cst = arith.constant dense<0.000000e+00> : vector<8x128xf32>
    %2 = tpu.matmul %0, %1, %cst {dimension_numbers = #tpu.dot_dimension_numbers<[1], [0], [0], [1], [0, 0, 1, 1], [], []>} : vector<8x128xf32>, vector<128x128xf32>, vector<8x128xf32> -> vector<8x128xf32>
    %c0_3 = arith.constant 0 : index
    %c0_4 = arith.constant 0 : index
    %3 = vector.load %arg3[%c0_3, %c0_4] : memref<1x128xf32, #tpu.memory_space<vmem>>, vector<1x128xf32>
    %4 = vector.broadcast %3 : vector<1x128xf32> to vector<8x128xf32>
    %5 = arith.addf %2, %4 : vector<8x128xf32>
    %cst_5 = arith.constant 0.000000e+00 : f32
    %6 = vector.broadcast %cst_5 : f32 to vector<8x128xf32>
    %7 = arith.maximumf %5, %6 : vector<8x128xf32>
    %c0_6 = arith.constant 0 : index
    %c0_7 = arith.constant 0 : index
    %8 = vector.load %arg4[%c0_6, %c0_7] : memref<128x128xf32, #tpu.memory_space<vmem>>, vector<128x128xf32>
    %cst_8 = arith.constant dense<0.000000e+00> : vector<8x128xf32>
    %9 = tpu.matmul %7, %8, %cst_8 {dimension_numbers = #tpu.dot_dimension_numbers<[1], [0], [0], [1], [0, 0, 1, 1], [], []>} : vector<8x128xf32>, vector<128x128xf32>, vector<8x128xf32> -> vector<8x128xf32>
    %c0_9 = arith.constant 0 : index
    %c0_10 = arith.constant 0 : index
    %10 = vector.load %arg5[%c0_9, %c0_10] : memref<1x128xf32, #tpu.memory_space<vmem>>, vector<1x128xf32>
    %11 = vector.broadcast %10 : vector<1x128xf32> to vector<8x128xf32>
    %12 = arith.addf %9, %11 : vector<8x128xf32>
    %cst_11 = arith.constant 0.000000e+00 : f32
    %13 = vector.broadcast %cst_11 : f32 to vector<8x128xf32>
    %14 = arith.maximumf %12, %13 : vector<8x128xf32>
    %c0_12 = arith.constant 0 : index
    %c0_13 = arith.constant 0 : index
    %15 = vector.load %arg6[%c0_12, %c0_13] : memref<128x128xf32, #tpu.memory_space<vmem>>, vector<128x128xf32>
    %cst_14 = arith.constant dense<0.000000e+00> : vector<8x128xf32>
    %16 = tpu.matmul %14, %15, %cst_14 {dimension_numbers = #tpu.dot_dimension_numbers<[1], [0], [0], [1], [0, 0, 1, 1], [], []>} : vector<8x128xf32>, vector<128x128xf32>, vector<8x128xf32> -> vector<8x128xf32>
    %c0_15 = arith.constant 0 : index
    %c0_16 = arith.constant 0 : index
    %17 = vector.load %arg7[%c0_15, %c0_16] : memref<1x128xf32, #tpu.memory_space<vmem>>, vector<1x128xf32>
    %18 = vector.broadcast %17 : vector<1x128xf32> to vector<8x128xf32>
    %19 = arith.addf %16, %18 : vector<8x128xf32>
    %c0_17 = arith.constant 0 : index
    %c0_18 = arith.constant 0 : index
    %20 = vector.load %arg8[%c0_17, %c0_18] : memref<8x128xf32, #tpu.memory_space<vmem>>, vector<8x128xf32>
    tpu.vector_store %arg8[%c0_17, %c0_18], %19 {strides = array<i32>} : memref<8x128xf32, #tpu.memory_space<vmem>>, vector<8x128xf32>,
    return
  }
  func.func @transform_0(%arg0: i32) -> (i32, i32) {
    %c0_i32 = arith.constant 0 : i32
    %c0_i32_0 = arith.constant 0 : i32
    return %arg0, %c0_i32 : i32, i32
  }
  func.func @transform_1(%arg0: i32) -> (i32, i32) {
    %c0_i32 = arith.constant 0 : i32
    %c0_i32_0 = arith.constant 0 : i32
    %c0_i32_1 = arith.constant 0 : i32
    return %c0_i32, %c0_i32_0 : i32, i32
  }
  func.func @transform_2(%arg0: i32) -> (i32, i32) {
    %c0_i32 = arith.constant 0 : i32
    %c0_i32_0 = arith.constant 0 : i32
    %c0_i32_1 = arith.constant 0 : i32
    return %c0_i32, %c0_i32_0 : i32, i32
  }
  func.func @transform_3(%arg0: i32) -> (i32, i32) {
    %c0_i32 = arith.constant 0 : i32
    %c0_i32_0 = arith.constant 0 : i32
    %c0_i32_1 = arith.constant 0 : i32
    return %c0_i32, %c0_i32_0 : i32, i32
  }
  func.func @transform_4(%arg0: i32) -> (i32, i32) {
    %c0_i32 = arith.constant 0 : i32
    %c0_i32_0 = arith.constant 0 : i32
    %c0_i32_1 = arith.constant 0 : i32
    return %c0_i32, %c0_i32_0 : i32, i32
  }
  func.func @transform_5(%arg0: i32) -> (i32, i32) {
    %c0_i32 = arith.constant 0 : i32
    %c0_i32_0 = arith.constant 0 : i32
    %c0_i32_1 = arith.constant 0 : i32
    return %c0_i32, %c0_i32_0 : i32, i32
  }
  func.func @transform_6(%arg0: i32) -> (i32, i32) {
    %c0_i32 = arith.constant 0 : i32
    %c0_i32_0 = arith.constant 0 : i32
    %c0_i32_1 = arith.constant 0 : i32
    return %c0_i32, %c0_i32_0 : i32, i32
  }
  func.func @transform_7(%arg0: i32) -> (i32, i32) {
    %c0_i32 = arith.constant 0 : i32
    %c0_i32_0 = arith.constant 0 : i32
    return %arg0, %c0_i32 : i32, i32
  }
}

</mosaic_0001>

<bundles_post_ra>
// kernel: _forward.1
= control target key start
LH: loop header
LB: loop body
LE: loop exit
PB: predicated region body
PF: predicated region fallthrough
CT: control target
= control target key end

     0   :  { %12 = vsyncpa [#allocation3], 0  ;;  %s746_s0 = inlined_call_operand.vmem [shape: f32[8,128], index: 0, kind: input, shape index: {}]   ;;  %s747_s1 = inlined_call_operand.hbm [shape: f32[128,128], index: 1, kind: input, shape index: {}]   ;;  %s748_s2 = inlined_call_operand.vmem [shape: f32[1,128], index: 2, kind: input, shape index: {}]   ;;  %s749_s3 = inlined_call_operand.hbm [shape: f32[128,128], index: 3, kind: input, shape index: {}]   ;;  %s750_s4 = inlined_call_operand.vmem [shape: f32[1,128], index: 4, kind: input, shape index: {}]   ;;  %s751_s5 = inlined_call_operand.hbm [shape: f32[128,128], index: 5, kind: input, shape index: {}]   ;;  %s752_s6 = inlined_call_operand.vmem [shape: f32[1,128], index: 6, kind: input, shape index: {}]   ;;  %s753_s7 = inlined_call_operand.hbm [shape: f32[8,128], index: 7, kind: output, shape index: {}]  }
   0x1   :  { %13 = vsyncpa [#allocation6], 0 }
   0x2   :  { %14 = vsyncpa [#allocation4], 0  ;;  %s620_s24 = smov [#allocation5]   ;;  %s621_s26 = smov [#allocation2]  }
   0x3   :  { %s36_s25 = sshll.u32 %s620_s24, 4  ;;  %s22_s27 = sshll.u32 %s621_s26, 4  ;;  %s37_s25 = int_to_ptr.vmem [resolvable:$true] %s36_s25  ;;  %s23_s27 = int_to_ptr.vmem [resolvable:$true] %s22_s27 }
   0x4   :  { %s542_s28 = scalar_lea.vmem %s37_s25, 2048  ;;  %p547_p1 = scmp.lt.s32.totalorder %s37_s25, %s37_s25 }
   0x5   :  { %p543_p0 = scmp.ne.s32.totalorder %s37_s25, %s542_s28  ;;  %p548_p2 = scmp.lt.s32.totalorder %s542_s28, %s542_s28 }
   0x7   :  { %p549_p3 = por %p548_p2, %p547_p1 }
   0x9   :  { %p550_p4 = pnand %p549_p3, %p543_p0 }
   0xb   :  { %553 = shalt.err (!%p550_p4)
}
   0xc   :  { %s622_s29 = smov 128   ;;  %s623_s30 = smov 8  }
   0xd   :  { %42 = dma.hbm_to_vmem [thread:$0]  %s749_s3, 2048, %s37_s25, [#allocation6], %s622_s29, %s622_s29, %s623_s30  }
   0xe   :  { %s562_s10 = scalar_lea.vmem %s23_s27, 2048  ;;  %p567_p6 = scmp.lt.s32.totalorder %s23_s27, %s23_s27 }
   0xf   :  { %p563_p5 = scmp.ne.s32.totalorder %s23_s27, %s562_s10  ;;  %p568_p7 = scmp.lt.s32.totalorder %s562_s10, %s562_s10 }
  0x11   :  { %p569_p8 = por %p568_p7, %p567_p6 }
  0x13   :  { %p570_p9 = pnand %p569_p8, %p563_p5 }
  0x15   :  { %573 = shalt.err (!%p570_p9)
}
  0x16   :  { %28 = dma.hbm_to_vmem [thread:$0]  %s747_s1, 2048, %s23_s27, [#allocation3], %s622_s29, %s622_s29, %s623_s30  }
  0x17   :  { %s624_s13 = smov [#allocation7]  }
  0x18   :  { %s50_s14 = sshll.u32 %s624_s13, 4  ;;  %s51_s14 = int_to_ptr.vmem [resolvable:$true] %s50_s14 }
  0x19   :  { %s582_s15 = scalar_lea.vmem %s51_s14, 2048  ;;  %p587_p11 = scmp.lt.s32.totalorder %s51_s14, %s51_s14 }
  0x1a   :  { %p583_p10 = scmp.ne.s32.totalorder %s51_s14, %s582_s15  ;;  %p588_p12 = scmp.lt.s32.totalorder %s582_s15, %s582_s15 }
  0x1c   :  { %p589_p13 = por %p588_p12, %p587_p11 }
  0x1e   :  { %p590_p0 = pnand %p589_p13, %p583_p10 }
  0x20   :  { %593 = shalt.err (!%p590_p0)
}
  0x21   :  { %56 = dma.hbm_to_vmem [thread:$0]  %s751_s5, 2048, %s51_s14, [#allocation6], %s622_s29, %s622_s29, %s623_s30  }
  0x22   :  { %614 = dma.done.wait [#allocation3], 2048  }
  0x23   :  { %615 = vsyncadd [#allocation3], 4294965248 }
  0x24   :  { %616 = dma.done.wait [#allocation6], 4096  }
  0x25   :  { %617 = vsyncadd [#allocation6], 4294963200  ;;  %v625_v0 = vmov 0.0   ;;  %vm626_vm0 = vmmov 0   ;;  %v84_v1 = vld [vmem:[#allocation2 + $0x78] sm:$0xff]  ;;  %v83_v2 = vld [vmem:[#allocation2 + $0x70] sm:$0xff] }
  0x26   :  { %421 = vmatprep.subr.mxu0 %v625_v0  ;;  %453 = vmatprep.mubr.msk.f32.mxu0 %vm626_vm0, %v625_v0  ;;  %v82_v3 = vld [vmem:[#allocation2 + $0x68] sm:$0xff]  ;;  %v81_v4 = vld [vmem:[#allocation2 + $0x60] sm:$0xff]  ;;  %v178_v5 = vld [vmem:[#allocation5 + $0x78] sm:$0xff]  ;;  %s627_s21 = smov [#allocation8]  }
  0x27   :  { %456 = vmatprep.subr.mxu1 %v625_v0  ;;  %488 = vmatprep.mubr.msk.f32.mxu1 %vm626_vm0, %v625_v0  ;;  %v80_v6 = vld [vmem:[#allocation2 + $0x58] sm:$0xff]  ;;  %v177_v7 = vld [vmem:[#allocation5 + $0x70] sm:$0xff]  ;;  %v176_v8 = vld [vmem:[#allocation5 + $0x68] sm:$0xff]  ;;  %s357_s22 = sshll.u32 %s627_s21, 4  ;;  %s358_s22 = int_to_ptr.vmem [resolvable:$true] %s357_s22 }
  0x28   :  { %422 = vmatpush3.msra.mxu0 %v84_v1  ;;  %457 = vmatpush3.msra.mxu1 %v178_v5  ;;  %v79_v9 = vld [vmem:[#allocation2 + $0x50] sm:$0xff]  ;;  %v175_v10 = vld [vmem:[#allocation5 + $0x60] sm:$0xff]  ;;  %v78_v11 = vld [vmem:[#allocation2 + $0x48] sm:$0xff]  ;;  %s594_s23 = scalar_lea.vmem %s358_s22, 128  ;;  %p599_p2 = scmp.lt.s32.totalorder %s358_s22, %s358_s22 }
  0x29   :  { %423 = vmatprep.subr.mxu0 %v625_v0  ;;  %458 = vmatprep.subr.mxu1 %v625_v0  ;;  %v174_v12 = vld [vmem:[#allocation5 + $0x58] sm:$0xff]  ;;  %v77_v13 = vld [vmem:[#allocation2 + $0x40] sm:$0xff]  ;;  %v173_v14 = vld [vmem:[#allocation5 + $0x50] sm:$0xff]  ;;  %p595_p1 = scmp.ne.s32.totalorder %s358_s22, %s594_s23  ;;  %p600_p3 = scmp.lt.s32.totalorder %s594_s23, %s594_s23 }
  0x2a   :  { %424 = vmatpush3.msra.mxu0 %v83_v2  ;;  %459 = vmatpush3.msra.mxu1 %v177_v7  ;;  %v76_v15 = vld [vmem:[#allocation2 + $0x38] sm:$0xff]  ;;  %v172_v16 = vld [vmem:[#allocation5 + $0x48] sm:$0xff]  ;;  %v75_v17 = vld [vmem:[#allocation2 + $0x30] sm:$0xff] }
  0x2b   :  { %425 = vmatprep.subr.mxu0 %v625_v0  ;;  %460 = vmatprep.subr.mxu1 %v625_v0  ;;  %v171_v18 = vld [vmem:[#allocation5 + $0x40] sm:$0xff]  ;;  %v74_v19 = vld [vmem:[#allocation2 + $0x28] sm:$0xff]  ;;  %v170_v20 = vld [vmem:[#allocation5 + $0x38] sm:$0xff]  ;;  %p601_p4 = por %p600_p3, %p599_p2 }
  0x2c   :  { %426 = vmatpush3.msra.mxu0 %v82_v3  ;;  %461 = vmatpush3.msra.mxu1 %v176_v8  ;;  %v73_v21 = vld [vmem:[#allocation2 + $0x20] sm:$0xff]  ;;  %v169_v22 = vld [vmem:[#allocation5 + $0x30] sm:$0xff]  ;;  %v72_v23 = vld [vmem:[#allocation2 + $0x18] sm:$0xff] }
  0x2d   :  { %427 = vmatprep.subr.mxu0 %v625_v0  ;;  %462 = vmatprep.subr.mxu1 %v625_v0  ;;  %v168_v24 = vld [vmem:[#allocation5 + $0x28] sm:$0xff]  ;;  %v71_v25 = vld [vmem:[#allocation2 + $0x10] sm:$0xff]  ;;  %v167_v26 = vld [vmem:[#allocation5 + $0x20] sm:$0xff]  ;;  %p602_p5 = pnand %p601_p4, %p595_p1 }
  0x2e   :  { %428 = vmatpush3.msra.mxu0 %v81_v4  ;;  %463 = vmatpush3.msra.mxu1 %v175_v10  ;;  %v70_v27 = vld [vmem:[#allocation2 + $0x8] sm:$0xff]  ;;  %v166_v28 = vld [vmem:[#allocation5 + $0x18] sm:$0xff]  ;;  %v69_v29 = vld [vmem:[#allocation2] sm:$0xff] }
  0x2f   :  { %429 = vmatprep.subr.mxu0 %v625_v0  ;;  %464 = vmatprep.subr.mxu1 %v625_v0  ;;  %v68_v30 = vld [vmem:[%s746_s0] sm:$0xff]  ;;  %v165_v31 = vld [vmem:[#allocation5 + $0x10] sm:$0xff]  ;;  %v164_v32 = vld [vmem:[#allocation5 + $0x8] sm:$0xff] }
  0x30   :  { %430 = vmatpush3.msra.mxu0 %v80_v6  ;;  %465 = vmatpush3.msra.mxu1 %v174_v12  ;;  %v163_v33 = vld [vmem:[#allocation5] sm:$0xff]  ;;  %v272_v34 = vld [vmem:[#allocation7 + $0x78] sm:$0xff]  ;;  %v271_v35 = vld [vmem:[#allocation7 + $0x70] sm:$0xff] }
  0x31   :  { %431 = vmatprep.subr.mxu0 %v625_v0  ;;  %466 = vmatprep.subr.mxu1 %v625_v0  ;;  %v270_v36 = vld [vmem:[#allocation7 + $0x68] sm:$0xff]  ;;  %v269_v37 = vld [vmem:[#allocation7 + $0x60] sm:$0xff]  ;;  %v268_v38 = vld [vmem:[#allocation7 + $0x58] sm:$0xff] }
  0x32   :  { %432 = vmatpush3.msra.mxu0 %v79_v9  ;;  %467 = vmatpush3.msra.mxu1 %v173_v14  ;;  %v267_v39 = vld [vmem:[#allocation7 + $0x50] sm:$0xff]  ;;  %v266_v40 = vld [vmem:[#allocation7 + $0x48] sm:$0xff]  ;;  %v265_v41 = vld [vmem:[#allocation7 + $0x40] sm:$0xff] }
  0x33   :  { %433 = vmatprep.subr.mxu0 %v625_v0  ;;  %468 = vmatprep.subr.mxu1 %v625_v0  ;;  %v264_v42 = vld [vmem:[#allocation7 + $0x38] sm:$0xff]  ;;  %v263_v43 = vld [vmem:[#allocation7 + $0x30] sm:$0xff]  ;;  %v262_v44 = vld [vmem:[#allocation7 + $0x28] sm:$0xff] }
  0x34   :  { %434 = vmatpush3.msra.mxu0 %v78_v11  ;;  %469 = vmatpush3.msra.mxu1 %v172_v16  ;;  %v261_v45 = vld [vmem:[#allocation7 + $0x20] sm:$0xff]  ;;  %v260_v46 = vld [vmem:[#allocation7 + $0x18] sm:$0xff]  ;;  %v259_v52 = vld [vmem:[#allocation7 + $0x10] sm:$0xff] }
  0x35   :  { %435 = vmatprep.subr.mxu0 %v625_v0  ;;  %470 = vmatprep.subr.mxu1 %v625_v0  ;;  %v367_v47 = vld [vmem:[%s748_s2] ss:$0 sm:$0xff]  ;;  %v258_v53 = vld [vmem:[#allocation7 + $0x8] sm:$0xff] }
  0x36   :  { %436 = vmatpush3.msra.mxu0 %v77_v13  ;;  %471 = vmatpush3.msra.mxu1 %v171_v18  ;;  %v257_v54 = vld [vmem:[#allocation7] sm:$0xff] }
  0x37   :  { %437 = vmatprep.subr.mxu0 %v625_v0  ;;  %472 = vmatprep.subr.mxu1 %v625_v0  ;;  %v368_v55 = vld [vmem:[%s750_s4] ss:$0 sm:$0xff] }
  0x38   :  { %438 = vmatpush3.msra.mxu0 %v76_v15  ;;  %473 = vmatpush3.msra.mxu1 %v170_v20  ;;  %v369_v60 = vld [vmem:[%s752_s6] ss:$0 sm:$0xff] }
  0x39   :  { %439 = vmatprep.subr.mxu0 %v625_v0  ;;  %474 = vmatprep.subr.mxu1 %v625_v0 }
  0x3a   :  { %440 = vmatpush3.msra.mxu0 %v75_v17  ;;  %475 = vmatpush3.msra.mxu1 %v169_v22 }
  0x3b   :  { %441 = vmatprep.subr.mxu0 %v625_v0  ;;  %476 = vmatprep.subr.mxu1 %v625_v0 }
  0x3c   :  { %442 = vmatpush3.msra.mxu0 %v74_v19  ;;  %477 = vmatpush3.msra.mxu1 %v168_v24 }
  0x3d   :  { %443 = vmatprep.subr.mxu0 %v625_v0  ;;  %478 = vmatprep.subr.mxu1 %v625_v0 }
  0x3e   :  { %444 = vmatpush3.msra.mxu0 %v73_v21  ;;  %479 = vmatpush3.msra.mxu1 %v167_v26 }
  0x3f   :  { %445 = vmatprep.subr.mxu0 %v625_v0  ;;  %480 = vmatprep.subr.mxu1 %v625_v0 }
  0x40   :  { %446 = vmatpush3.msra.mxu0 %v72_v23  ;;  %481 = vmatpush3.msra.mxu1 %v166_v28 }
  0x41   :  { %447 = vmatprep.subr.mxu0 %v625_v0  ;;  %482 = vmatprep.subr.mxu1 %v625_v0 }
  0x42   :  { %448 = vmatpush3.msra.mxu0 %v71_v25  ;;  %483 = vmatpush3.msra.mxu1 %v165_v31 }
  0x43   :  { %449 = vmatprep.subr.mxu0 %v625_v0  ;;  %484 = vmatprep.subr.mxu1 %v625_v0 }
  0x44   :  { %450 = vmatpush3.msra.mxu0 %v70_v27  ;;  %485 = vmatpush3.msra.mxu1 %v164_v32 }
  0x45   :  { %451 = vmatprep.subr.mxu0 %v625_v0  ;;  %486 = vmatprep.subr.mxu1 %v625_v0 }
  0x46   :  { %452 = vmatpush3.msra.mxu0 %v69_v29  ;;  %487 = vmatpush3.msra.mxu1 %v163_v33 }
  0x47   :  { %454 = vmatmul.mubr.f32.vlgmr.msra.gmra.mxu0 %v68_v30  ;;  %491 = vmatprep.subr.mxu0 %v625_v0 }
  0x48   :  { %523 = vmatprep.mubr.msk.f32.mxu0 %vm626_vm0, %v625_v0  ;;  %492 = vmatpush3.msra.mxu0 %v272_v34 }
  0x49   :  { %493 = vmatprep.subr.mxu0 %v625_v0 }
  0x4a   :  { %494 = vmatpush3.msra.mxu0 %v271_v35 }
  0x4b   :  { %495 = vmatprep.subr.mxu0 %v625_v0 }
  0x4c   :  { %496 = vmatpush3.msra.mxu0 %v270_v36 }
  0x4d   :  { %497 = vmatprep.subr.mxu0 %v625_v0 }
  0x4e   :  { %498 = vmatpush3.msra.mxu0 %v269_v37 }
  0x4f   :  { %499 = vmatprep.subr.mxu0 %v625_v0 }
  0x50   :  { %500 = vmatpush3.msra.mxu0 %v268_v38 }
  0x51   :  { %501 = vmatprep.subr.mxu0 %v625_v0 }
  0x52   :  { %502 = vmatpush3.msra.mxu0 %v267_v39 }
  0x53   :  { %503 = vmatprep.subr.mxu0 %v625_v0 }
  0x54   :  { %504 = vmatpush3.msra.mxu0 %v266_v40 }
  0x55   :  { %505 = vmatprep.subr.mxu0 %v625_v0 }
  0x56   :  { %506 = vmatpush3.msra.mxu0 %v265_v41 }
  0x57   :  { %507 = vmatprep.subr.mxu0 %v625_v0 }
  0x58   :  { %508 = vmatpush3.msra.mxu0 %v264_v42 }
  0x59   :  { %509 = vmatprep.subr.mxu0 %v625_v0 }
  0x5a   :  { %510 = vmatpush3.msra.mxu0 %v263_v43 }
  0x5b   :  { %511 = vmatprep.subr.mxu0 %v625_v0 }
  0x5c   :  { %512 = vmatpush3.msra.mxu0 %v262_v44 }
  0x5d   :  { %513 = vmatprep.subr.mxu0 %v625_v0 }
  0x5e   :  { %514 = vmatpush3.msra.mxu0 %v261_v45 }
  0x5f   :  { %515 = vmatprep.subr.mxu0 %v625_v0 }
  0x60   :  { %516 = vmatpush3.msra.mxu0 %v260_v46 }
  0x61   :  { %517 = vmatprep.subr.mxu0 %v625_v0 }
  0x62   :  { %518 = vmatpush3.msra.mxu0 %v259_v52 }
  0x63   :  { %519 = vmatprep.subr.mxu0 %v625_v0 }
  0x64   :  { %520 = vmatpush3.msra.mxu0 %v258_v53 }
  0x65   :  { %521 = vmatprep.subr.mxu0 %v625_v0 }
  0x66   :  { %522 = vmatpush3.msra.mxu0 %v257_v54 }
 0x107   :  { %v158_v48 = vpop.f32.mrf.mxu0 }
 0x108   :  { %v159_v49 = vadd.f32 %v367_v47, %v158_v48 }
 0x109   :  { %v455_v50 = vpop.f32.mrf.mxu0 }
 0x10a   :  { %v162_v51 = vmax.f32 %v159_v49, 0.0 }
 0x10c   :  { %489 = vmatmul.mubr.f32.vlgmr.msra.gmra.mxu1 %v162_v51 }
 0x1cc   :  { %v252_v56 = vpop.f32.mrf.mxu1 }
 0x1cd   :  { %v253_v57 = vadd.f32 %v368_v55, %v252_v56 }
 0x1ce   :  { %v490_v58 = vpop.f32.mrf.mxu1 }
 0x1cf   :  { %v256_v59 = vmax.f32 %v253_v57, 0.0 }
 0x1d1   :  { %524 = vmatmul.mubr.f32.vlgmr.msra.gmra.mxu0 %v256_v59 }
 0x291   :  { %v346_v61 = vpop.f32.mrf.mxu0 }
 0x292   :  { %v347_v62 = vadd.f32 %v369_v60, %v346_v61 }
 0x293   :  { %v525_v63 = vpop.f32.mrf.mxu0 }
 0x294   :  { %350 = vst [vmem:[#allocation8] sm:$0xff] %v347_v62 }
 0x295   :  { %605 = shalt.err (!%p602_p5)
}
 0x296   :  { %360 = dma.vmem_to_hbm [thread:$0]  %s358_s22, 128, %s753_s7, [#allocation4]  }
 0x297   :  { %618 = dma.done.wait [#allocation4], 128  }
 0x298   :  { %619 = vsyncadd [#allocation4], 4294967168 }
 0x299   :  { %364 = vsyncpa [#allocation3], 1 }
 0x29a   :  { %365 = vsyncpa [#allocation6], 1 }
 0x29b   :  { %366 = vsyncpa [#allocation4], 1 }

</bundles_post_ra>
